<compile_context>
chip_gen: v6e
topology: v6e:2x2x1
jax: 0.10.0
libtpu: 0.0.40
codegen_flags: <defaults>
</compile_context>

<pallas_src>
import math

import jax
import jax.numpy as jnp
from jax import lax
from jax.experimental import pallas as pl
from jax.experimental.pallas import tpu as pltpu


def _round_up(a: int, b: int) -> int:
    return ((a + b - 1) // b) * b


# ----------------------------------------------------------------------------- #
# Kernel A (default, moderate L): precomputed shifted-filter (Toeplitz) stack.
#   x_ref : (TB, L, LANES)   packed input tile (P batches along lanes)
#   ks_ref: (L,  L, LANES)   ks[tau, t, c] = k[t - tau, c] (0 if t<tau) + [t==tau]
#   o_ref : (TB, L, LANES)
# Inner loop: y[t,c] += ks[tau, t, c] * x[tau, c]  -> pure vld + VALU.
# ----------------------------------------------------------------------------- #
def _conv_kernel_kstack(x_ref, ks_ref, o_ref):
    tb, L, lanes = x_ref.shape
    tap_unroll = min(8, L) if L > 1 else 1

    def per_group(g, carry):
        def per_tau(tau, acc):
            # (1, lanes) row of x, sublane-broadcast against the shifted filter copy.
            x_row = x_ref[g, pl.ds(tau, 1), :].astype(jnp.float32)
            return acc + ks_ref[tau].astype(jnp.float32) * x_row

        acc = lax.fori_loop(0, L, per_tau,
                            jnp.zeros((L, lanes), jnp.float32),
                            unroll=tap_unroll)
        o_ref[g] = acc.astype(o_ref.dtype)
        return carry

    lax.fori_loop(0, tb, per_group, 0, unroll=bool(tb <= 4))


# ----------------------------------------------------------------------------- #
# Kernel B (fallback, large L): incremental roll-by-1 causal shift.
#   x_ref : (TB, L, LANES)
#   k_ref : (L, 1, LANES)    per-tap filter rows (loaded per tap, not pinned)
#   o_ref : (TB, L, LANES)
# ----------------------------------------------------------------------------- #
def _conv_kernel_roll(x_ref, k_ref, o_ref):
    tb, L, lanes = x_ref.shape
    # Hoisted keep-mask: zero row 0 after each roll-by-1 so zeros (not wrapped
    # rows) enter from the top -> circular roll == causal shift. No per-tap
    # iota / 2L padded buffer / concatenate.
    keep = (lax.broadcasted_iota(jnp.int32, (L, lanes), 0) > 0).astype(jnp.float32)

    def per_group(g, carry):
        x = x_ref[g].astype(jnp.float32)                      # (L, lanes)
        y = x + k_ref[0].astype(jnp.float32) * x              # residual + tap s=0

        def per_tap(s, state):
            y, buf = state
            buf = pltpu.roll(buf, shift=1, axis=0) * keep     # == x shifted by s taps
            y = y + k_ref[s].astype(jnp.float32) * buf        # per-tap row load
            return (y, buf)

        y, _ = lax.fori_loop(1, L, per_tap, (y, x),
                             unroll=min(4, max(1, L - 1)))
        o_ref[g] = y.astype(o_ref.dtype)
        return carry

    lax.fori_loop(0, tb, per_group, 0, unroll=bool(tb <= 4))


# ----------------------------------------------------------------------------- #
# Wrapper: filter MLP (hoisted), lane-dense packing, batch-group tiling
# ----------------------------------------------------------------------------- #
def _pick_channel_packing(D: int):
    """Return (d_pad, P): pad channels to d_pad and pack P batches along lanes
    so the lane width P*d_pad is a multiple of 128 (dense, unmasked stores)."""
    if D % 128 == 0:
        return D, 1
    if D <= 128:
        d_pad = 1 << max(0, (D - 1).bit_length())   # next pow2 -> divides 128
        d_pad = max(d_pad, 1)
        return d_pad, 128 // d_pad
    return _round_up(D, 128), 1


def implicit_long_conv(x, z, w1, b1, w2, b2, *,
                       filter_mode="auto",
                       target_tile_bytes=4 << 20,
                       kstack_vmem_budget=8 << 20):
    """x: (B, L, D); z: (L, d_emb); MLP params laid out as (in, out)."""
    B, L, D = x.shape
    out_dtype = x.dtype

    # 1) Implicit filter k = ReLU(z @ W1 + b1) @ W2 + b2, computed ONCE in the
    #    wrapper (tiny matmuls are pure overhead inside the grid loop).
    zf = z.astype(jnp.float32)
    k = jnp.maximum(zf @ w1.astype(jnp.float32) + b1.astype(jnp.float32), 0.0)
    k = k @ w2.astype(jnp.float32) + b2.astype(jnp.float32)            # (L, D)

    # 2) Lane-dense packing: pad channels and pack P batches side by side.
    d_pad, P = _pick_channel_packing(D)
    if d_pad != D:
        x = jnp.pad(x, ((0, 0), (0, 0), (0, d_pad - D)))
        k = jnp.pad(k, ((0, 0), (0, d_pad - D)))
    lanes = P * d_pad
    B_pad = _round_up(B, P)
    if B_pad != B:
        x = jnp.pad(x, ((0, B_pad - B), (0, 0), (0, 0)))
    G = B_pad // P
    # TODO(synk): when stacking layers, keep activations in the packed
    # (G, L, lanes) layout across layers to avoid the extra HBM pass these
    # pack/unpack transposes cost in the mem-bound small-L regime.
    xg = x.reshape(G, P, L, d_pad).transpose(0, 2, 1, 3).reshape(G, L, lanes)

    # 3) Filter operand: group-invariant Toeplitz stack (zero in-kernel XLU),
    #    falling back to the incremental-roll kernel when it won't fit VMEM.
    kstack_bytes = L * L * lanes * 4
    if filter_mode == "auto":
        filter_mode = "kstack" if kstack_bytes <= kstack_vmem_budget else "roll"

    if filter_mode == "kstack":
        t = jnp.arange(L)
        diff = t[None, :] - t[:, None]                       # diff[tau, t] = t - tau
        kk = k[jnp.clip(diff, 0, L - 1)]                     # (L, L, d_pad)
        kk = jnp.where((diff >= 0)[..., None], kk, 0.0)      # causal (lower-tri)
        kk = kk + (diff == 0)[..., None].astype(jnp.float32)  # fold residual
        k_in = jnp.tile(kk, (1, 1, P)).astype(jnp.float32)    # (L, L, lanes)
        kernel_fn = _conv_kernel_kstack
        k_spec = pl.BlockSpec((L, L, lanes), lambda i: (0, 0, 0))
        k_bytes = kstack_bytes
    else:
        # TODO(synk): for very long L (>= ~512) add the blocked lower-triangular
        # Toeplitz MXU path (and sequence chunking) instead of the O(L^2) VPU
        # tap loop.
        k_in = jnp.tile(k, (1, P)).reshape(L, 1, lanes).astype(jnp.float32)
        kernel_fn = _conv_kernel_roll
        k_spec = pl.BlockSpec((L, 1, lanes), lambda i: (0, 0, 0))
        k_bytes = L * lanes * 4

    # 4) Batch-group tile: biggest TB under the byte budget, but keep >= 4 grid
    #    steps whenever G permits (megacore sharding + DMA/compute overlap).
    item = jnp.dtype(out_dtype).itemsize
    bytes_per_group = 2 * L * lanes * item                    # in + out rows
    tb_cap = max(1, int(target_tile_bytes) // max(1, bytes_per_group))
    if G >= 4:
        tb_cap = min(tb_cap, max(1, G // 4))
    tb_cap = max(1, min(tb_cap, G))
    TB = 1
    for cand in range(tb_cap, 0, -1):
        if G % cand == 0:
            TB = cand
            break
    grid = (G // TB,)

    # 5) VMEM limit from actual buffer sizes (double-buffered in/out tiles plus
    #    the resident filter), capped at 48 MiB (safe on v7x / v6e / v5e).
    tile_bytes = TB * L * lanes * item
    vmem_limit = int(min(max(32 << 20, 4 * tile_bytes + 2 * k_bytes + (4 << 20)),
                         48 << 20))

    out = pl.pallas_call(
        kernel_fn,
        out_shape=jax.ShapeDtypeStruct((G, L, lanes), out_dtype),
        grid_spec=pltpu.PrefetchScalarGridSpec(
            num_scalar_prefetch=0,
            grid=grid,
            in_specs=[
                pl.BlockSpec((TB, L, lanes), lambda i: (i, 0, 0)),  # packed x
                k_spec,                                             # resident filter
            ],
            out_specs=pl.BlockSpec((TB, L, lanes), lambda i: (i, 0, 0)),
        ),
        compiler_params=pltpu.CompilerParams(
            dimension_semantics=("parallel",),
            vmem_limit_bytes=vmem_limit,
        ),
    )(xg, k_in)

    # 6) Unpack lanes back to (B, L, D).
    y = out.reshape(G, L, P, d_pad).transpose(0, 2, 1, 3).reshape(B_pad, L, d_pad)
    return y[:B, :, :D]


# ----------------------------------------------------------------------------- #
# Positional embedding (matches PositionalEmbedding.__init__ / forward)
# ----------------------------------------------------------------------------- #
def positional_embedding(emb_dim: int, seq_len: int, L=None):
    assert emb_dim % 2 != 0 and emb_dim >= 3
    if L is None:
        L = seq_len
    t = jnp.linspace(0.0, 1.0, seq_len)[:, None]                    # (seq_len, 1)
    bands = (emb_dim - 1) // 2
    t_rescaled = jnp.linspace(0.0, seq_len - 1, seq_len)[:, None]   # (seq_len, 1)
    w = 2.0 * math.pi * t_rescaled / seq_len
    f = jnp.linspace(0.0001, bands - 1, bands)[None, :]             # (1, bands)
    zc = jnp.exp(-1j * f * w)                                       # (seq_len, bands)
    z = jnp.concatenate([t, zc.real, zc.imag], axis=-1)             # (seq_len, emb_dim)
    return z[:L].astype(jnp.float32)


# ----------------------------------------------------------------------------- #
# Pure-JAX reference (FFT path, mirrors torch fft_conv) for verification
# ----------------------------------------------------------------------------- #
def reference_forward(x, z, w1, b1, w2, b2):
    k = jnp.maximum(z @ w1 + b1, 0.0) @ w2 + b2                     # (L, D)
    u = jnp.transpose(x, (0, 2, 1)).astype(jnp.float32)             # (B, D, L)
    kt = k.T                                                        # (D, L)
    L = u.shape[-1]
    n = 2 * L
    k_f = jnp.fft.rfft(kt, n=n) / n
    u_f = jnp.fft.rfft(u, n=n)
    y = jnp.fft.irfft(u_f * k_f, n=n, norm="forward")[..., :L] + u
    return jnp.transpose(y, (0, 2, 1)).astype(x.dtype)


# ----------------------------------------------------------------------------- #
if __name__ == "__main__":
    B, L, D = 2, 8, 32            # batch, seq (= l_max), d_model
    d_emb, d_hidden = 3, 16

    key = jax.random.PRNGKey(0)
    k1, k2, k3, k4, k5 = jax.random.split(key, 5)
    x = jax.random.normal(k1, (B, L, D), jnp.float32)
    w1 = jax.random.normal(k2, (d_emb, d_hidden), jnp.float32) / math.sqrt(d_emb)
    b1 = 0.1 * jax.random.normal(k3, (d_hidden,), jnp.float32)
    w2 = jax.random.normal(k4, (d_hidden, D), jnp.float32) / math.sqrt(d_hidden)
    b2 = 0.1 * jax.random.normal(k5, (D,), jnp.float32)

    z = positional_embedding(d_emb, L)                              # (L, d_emb)
    y_ref = reference_forward(x, z, w1, b1, w2, b2)

    # Primary path: precomputed Toeplitz filter stack (moderate L).
    y = implicit_long_conv(x, z, w1, b1, w2, b2)
    jax.block_until_ready(y)
    assert y.shape == (B, L, D) and y.dtype == x.dtype
    assert jnp.allclose(y, y_ref, rtol=1e-3, atol=1e-3), "kstack path mismatch"

    # Large-L fallback (incremental roll-by-1), exercised at the same shape.
    y2 = implicit_long_conv(x, z, w1, b1, w2, b2, filter_mode="roll")
    jax.block_until_ready(y2)
    assert jnp.allclose(y2, y_ref, rtol=1e-3, atol=1e-3), "roll path mismatch"

    print("KERNEL_OK")
</pallas_src>

<mosaic_0001>
module attributes {stable_mosaic.version = 11 : i64} {
  func.func @_conv_kernel_kstack(%arg0: i32, %arg1: memref<1x8x128xf32, #tpu.memory_space<vmem>>, %arg2: memref<8x8x128xf32, #tpu.memory_space<vmem>>, %arg3: memref<1x8x128xf32, #tpu.memory_space<vmem>>) attributes {dimension_semantics = [#tpu.dimension_semantics<parallel>], iteration_bounds = array<i64: 1>, scalar_prefetch = 0 : i64, scratch_operands = 0 : i64, tpu.core_type = #tpu.core_type<tc>, window_params = [{transform_indices = @transform_0, window_bounds = array<i64: 1, 8, 128>}, {pipeline_mode = #tpu.pipeline_mode<synchronous>, transform_indices = @transform_1, window_bounds = array<i64: 8, 8, 128>}, {transform_indices = @transform_2, window_bounds = array<i64: 1, 8, 128>}]} {
    %c0_i32 = arith.constant 0 : i32
    %cst = arith.constant 0.000000e+00 : f32
    %0 = vector.broadcast %cst : f32 to vector<8x128xf32>
    %c0_i32_0 = arith.constant 0 : i32
    %1 = arith.index_cast %c0_i32 : i32 to index
    %2 = arith.index_cast %c0_i32_0 : i32 to index
    %c0 = arith.constant 0 : index
    %3 = vector.load %arg1[%1, %2, %c0] : memref<1x8x128xf32, #tpu.memory_space<vmem>>, vector<1x1x128xf32>
    %4 = vector.shape_cast %3 : vector<1x1x128xf32> to vector<1x128xf32>
    %5 = arith.index_cast %c0_i32_0 : i32 to index
    %c0_1 = arith.constant 0 : index
    %c0_2 = arith.constant 0 : index
    %6 = vector.load %arg2[%5, %c0_1, %c0_2] : memref<8x8x128xf32, #tpu.memory_space<vmem>>, vector<1x8x128xf32>
    %7 = vector.shape_cast %6 : vector<1x8x128xf32> to vector<8x128xf32>
    %8 = vector.broadcast %4 : vector<1x128xf32> to vector<8x128xf32>
    %9 = arith.mulf %7, %8 : vector<8x128xf32>
    %10 = arith.addf %0, %9 : vector<8x128xf32>
    %c1_i32 = arith.constant 1 : i32
    %11 = arith.index_cast %c0_i32 : i32 to index
    %12 = arith.index_cast %c1_i32 : i32 to index
    %c0_3 = arith.constant 0 : index
    %13 = vector.load %arg1[%11, %12, %c0_3] : memref<1x8x128xf32, #tpu.memory_space<vmem>>, vector<1x1x128xf32>
    %14 = vector.shape_cast %13 : vector<1x1x128xf32> to vector<1x128xf32>
    %15 = arith.index_cast %c1_i32 : i32 to index
    %c0_4 = arith.constant 0 : index
    %c0_5 = arith.constant 0 : index
    %16 = vector.load %arg2[%15, %c0_4, %c0_5] : memref<8x8x128xf32, #tpu.memory_space<vmem>>, vector<1x8x128xf32>
    %17 = vector.shape_cast %16 : vector<1x8x128xf32> to vector<8x128xf32>
    %18 = vector.broadcast %14 : vector<1x128xf32> to vector<8x128xf32>
    %19 = arith.mulf %17, %18 : vector<8x128xf32>
    %20 = arith.addf %10, %19 : vector<8x128xf32>
    %c2_i32 = arith.constant 2 : i32
    %21 = arith.index_cast %c0_i32 : i32 to index
    %22 = arith.index_cast %c2_i32 : i32 to index
    %c0_6 = arith.constant 0 : index
    %23 = vector.load %arg1[%21, %22, %c0_6] : memref<1x8x128xf32, #tpu.memory_space<vmem>>, vector<1x1x128xf32>
    %24 = vector.shape_cast %23 : vector<1x1x128xf32> to vector<1x128xf32>
    %25 = arith.index_cast %c2_i32 : i32 to index
    %c0_7 = arith.constant 0 : index
    %c0_8 = arith.constant 0 : index
    %26 = vector.load %arg2[%25, %c0_7, %c0_8] : memref<8x8x128xf32, #tpu.memory_space<vmem>>, vector<1x8x128xf32>
    %27 = vector.shape_cast %26 : vector<1x8x128xf32> to vector<8x128xf32>
    %28 = vector.broadcast %24 : vector<1x128xf32> to vector<8x128xf32>
    %29 = arith.mulf %27, %28 : vector<8x128xf32>
    %30 = arith.addf %20, %29 : vector<8x128xf32>
    %c3_i32 = arith.constant 3 : i32
    %31 = arith.index_cast %c0_i32 : i32 to index
    %32 = arith.index_cast %c3_i32 : i32 to index
    %c0_9 = arith.constant 0 : index
    %33 = vector.load %arg1[%31, %32, %c0_9] : memref<1x8x128xf32, #tpu.memory_space<vmem>>, vector<1x1x128xf32>
    %34 = vector.shape_cast %33 : vector<1x1x128xf32> to vector<1x128xf32>
    %35 = arith.index_cast %c3_i32 : i32 to index
    %c0_10 = arith.constant 0 : index
    %c0_11 = arith.constant 0 : index
    %36 = vector.load %arg2[%35, %c0_10, %c0_11] : memref<8x8x128xf32, #tpu.memory_space<vmem>>, vector<1x8x128xf32>
    %37 = vector.shape_cast %36 : vector<1x8x128xf32> to vector<8x128xf32>
    %38 = vector.broadcast %34 : vector<1x128xf32> to vector<8x128xf32>
    %39 = arith.mulf %37, %38 : vector<8x128xf32>
    %40 = arith.addf %30, %39 : vector<8x128xf32>
    %c4_i32 = arith.constant 4 : i32
    %41 = arith.index_cast %c0_i32 : i32 to index
    %42 = arith.index_cast %c4_i32 : i32 to index
    %c0_12 = arith.constant 0 : index
    %43 = vector.load %arg1[%41, %42, %c0_12] : memref<1x8x128xf32, #tpu.memory_space<vmem>>, vector<1x1x128xf32>
    %44 = vector.shape_cast %43 : vector<1x1x128xf32> to vector<1x128xf32>
    %45 = arith.index_cast %c4_i32 : i32 to index
    %c0_13 = arith.constant 0 : index
    %c0_14 = arith.constant 0 : index
    %46 = vector.load %arg2[%45, %c0_13, %c0_14] : memref<8x8x128xf32, #tpu.memory_space<vmem>>, vector<1x8x128xf32>
    %47 = vector.shape_cast %46 : vector<1x8x128xf32> to vector<8x128xf32>
    %48 = vector.broadcast %44 : vector<1x128xf32> to vector<8x128xf32>
    %49 = arith.mulf %47, %48 : vector<8x128xf32>
    %50 = arith.addf %40, %49 : vector<8x128xf32>
    %c5_i32 = arith.constant 5 : i32
    %51 = arith.index_cast %c0_i32 : i32 to index
    %52 = arith.index_cast %c5_i32 : i32 to index
    %c0_15 = arith.constant 0 : index
    %53 = vector.load %arg1[%51, %52, %c0_15] : memref<1x8x128xf32, #tpu.memory_space<vmem>>, vector<1x1x128xf32>
    %54 = vector.shape_cast %53 : vector<1x1x128xf32> to vector<1x128xf32>
    %55 = arith.index_cast %c5_i32 : i32 to index
    %c0_16 = arith.constant 0 : index
    %c0_17 = arith.constant 0 : index
    %56 = vector.load %arg2[%55, %c0_16, %c0_17] : memref<8x8x128xf32, #tpu.memory_space<vmem>>, vector<1x8x128xf32>
    %57 = vector.shape_cast %56 : vector<1x8x128xf32> to vector<8x128xf32>
    %58 = vector.broadcast %54 : vector<1x128xf32> to vector<8x128xf32>
    %59 = arith.mulf %57, %58 : vector<8x128xf32>
    %60 = arith.addf %50, %59 : vector<8x128xf32>
    %c6_i32 = arith.constant 6 : i32
    %61 = arith.index_cast %c0_i32 : i32 to index
    %62 = arith.index_cast %c6_i32 : i32 to index
    %c0_18 = arith.constant 0 : index
    %63 = vector.load %arg1[%61, %62, %c0_18] : memref<1x8x128xf32, #tpu.memory_space<vmem>>, vector<1x1x128xf32>
    %64 = vector.shape_cast %63 : vector<1x1x128xf32> to vector<1x128xf32>
    %65 = arith.index_cast %c6_i32 : i32 to index
    %c0_19 = arith.constant 0 : index
    %c0_20 = arith.constant 0 : index
    %66 = vector.load %arg2[%65, %c0_19, %c0_20] : memref<8x8x128xf32, #tpu.memory_space<vmem>>, vector<1x8x128xf32>
    %67 = vector.shape_cast %66 : vector<1x8x128xf32> to vector<8x128xf32>
    %68 = vector.broadcast %64 : vector<1x128xf32> to vector<8x128xf32>
    %69 = arith.mulf %67, %68 : vector<8x128xf32>
    %70 = arith.addf %60, %69 : vector<8x128xf32>
    %c7_i32 = arith.constant 7 : i32
    %71 = arith.index_cast %c0_i32 : i32 to index
    %72 = arith.index_cast %c7_i32 : i32 to index
    %c0_21 = arith.constant 0 : index
    %73 = vector.load %arg1[%71, %72, %c0_21] : memref<1x8x128xf32, #tpu.memory_space<vmem>>, vector<1x1x128xf32>
    %74 = vector.shape_cast %73 : vector<1x1x128xf32> to vector<1x128xf32>
    %75 = arith.index_cast %c7_i32 : i32 to index
    %c0_22 = arith.constant 0 : index
    %c0_23 = arith.constant 0 : index
    %76 = vector.load %arg2[%75, %c0_22, %c0_23] : memref<8x8x128xf32, #tpu.memory_space<vmem>>, vector<1x8x128xf32>
    %77 = vector.shape_cast %76 : vector<1x8x128xf32> to vector<8x128xf32>
    %78 = vector.broadcast %74 : vector<1x128xf32> to vector<8x128xf32>
    %79 = arith.mulf %77, %78 : vector<8x128xf32>
    %80 = arith.addf %70, %79 : vector<8x128xf32>
    %c8_i32 = arith.constant 8 : i32
    %81 = arith.index_cast %c0_i32 : i32 to index
    %c0_24 = arith.constant 0 : index
    %c0_25 = arith.constant 0 : index
    %82 = vector.load %arg3[%81, %c0_24, %c0_25] : memref<1x8x128xf32, #tpu.memory_space<vmem>>, vector<1x8x128xf32>
    %83 = vector.shape_cast %82 : vector<1x8x128xf32> to vector<8x128xf32>
    %84 = vector.shape_cast %80 : vector<8x128xf32> to vector<1x8x128xf32>
    tpu.vector_store %arg3[%81, %c0_24, %c0_25], %84 {strides = array<i32>} : memref<1x8x128xf32, #tpu.memory_space<vmem>>, vector<1x8x128xf32>,
    %c1_i32_26 = arith.constant 1 : i32
    return
  }
  func.func @transform_0(%arg0: i32) -> (i32, i32, i32) {
    %c0_i32 = arith.constant 0 : i32
    %c0_i32_0 = arith.constant 0 : i32
    %c0_i32_1 = arith.constant 0 : i32
    return %arg0, %c0_i32, %c0_i32_0 : i32, i32, i32
  }
  func.func @transform_1(%arg0: i32) -> (i32, i32, i32) {
    %c0_i32 = arith.constant 0 : i32
    %c0_i32_0 = arith.constant 0 : i32
    %c0_i32_1 = arith.constant 0 : i32
    %c0_i32_2 = arith.constant 0 : i32
    return %c0_i32, %c0_i32_0, %c0_i32_1 : i32, i32, i32
  }
  func.func @transform_2(%arg0: i32) -> (i32, i32, i32) {
    %c0_i32 = arith.constant 0 : i32
    %c0_i32_0 = arith.constant 0 : i32
    %c0_i32_1 = arith.constant 0 : i32
    return %arg0, %c0_i32, %c0_i32_0 : i32, i32, i32
  }
}

</mosaic_0001>

<bundles_post_ra>
// kernel: tpu_custom_call.1
= control target key start
LH: loop header
LB: loop body
LE: loop exit
PB: predicated region body
PF: predicated region fallthrough
CT: control target
= control target key end

     0   :  { %7 = vsyncpa [#allocation3], 0  ;;  %s234_s0 = inlined_call_operand.hbm [shape: f32[1,8,128], index: 0, kind: input, shape index: {}]   ;;  %s235_s1 = inlined_call_operand.hbm [shape: f32[8,8,128], index: 1, kind: input, shape index: {}]   ;;  %s236_s2 = inlined_call_operand.hbm [shape: f32[1,8,128], index: 2, kind: output, shape index: {}]  }
   0x1   :  { %8 = vsyncpa [#allocation6], 0 }
   0x2   :  { %9 = vsyncpa [#allocation4], 0  ;;  %s205_s9 = smov [#allocation2]   ;;  %s206_s11 = smov [#allocation5]  }
   0x3   :  { %s16_s10 = sshll.u32 %s205_s9, 4  ;;  %s25_s12 = sshll.u32 %s206_s11, 4  ;;  %s17_s10 = int_to_ptr.vmem [resolvable:$true] %s16_s10  ;;  %s26_s12 = int_to_ptr.vmem [resolvable:$true] %s25_s12 }
   0x4   :  { %s147_s13 = scalar_lea.vmem %s17_s10, 128  ;;  %p152_p1 = scmp.lt.s32.totalorder %s17_s10, %s17_s10 }
   0x5   :  { %p148_p0 = scmp.ne.s32.totalorder %s17_s10, %s147_s13  ;;  %p153_p2 = scmp.lt.s32.totalorder %s147_s13, %s147_s13 }
   0x7   :  { %p154_p3 = por %p153_p2, %p152_p1 }
   0x9   :  { %p155_p4 = pnand %p154_p3, %p148_p0 }
   0xb   :  { %158 = shalt.err (!%p155_p4)
}
   0xc   :  { %19 = dma.hbm_to_vmem [thread:$0]  %s234_s0, 128, %s17_s10, [#allocation3]  }
   0xd   :  { %s167_s16 = scalar_lea.vmem %s26_s12, 1024  ;;  %p172_p6 = scmp.lt.s32.totalorder %s26_s12, %s26_s12 }
   0xe   :  { %p168_p5 = scmp.ne.s32.totalorder %s26_s12, %s167_s16  ;;  %p173_p7 = scmp.lt.s32.totalorder %s167_s16, %s167_s16 }
  0x10   :  { %p174_p8 = por %p173_p7, %p172_p6 }
  0x12   :  { %p175_p9 = pnand %p174_p8, %p168_p5 }
  0x14   :  { %178 = shalt.err (!%p175_p9)
}
  0x15   :  { %s207_s17 = smov 128   ;;  %s208_s18 = smov 8  }
  0x16   :  { %31 = dma.hbm_to_vmem [thread:$0]  %s235_s1, 1024, %s26_s12, [#allocation6], %s207_s17, %s207_s17, %s208_s18  }
  0x17   :  { %199 = dma.done.wait [#allocation3], 128  }
  0x18   :  { %200 = vsyncadd [#allocation3], 4294967168 }
  0x19   :  { %201 = dma.done.wait [#allocation6], 1024  }
  0x1a   :  { %202 = vsyncadd [#allocation6], 4294966272  ;;  %v126_v0 = vld [vmem:[#allocation2] ss:$0 sm:$0xff]  ;;  %v39_v1 = vld [vmem:[#allocation5] sm:$0xff]  ;;  %s209_s0 = smov [#allocation7]  }
  0x1b   :  { %v127_v2 = vld [vmem:[#allocation2 + $0x1] ss:$0 sm:$0xff]  ;;  %v44_v3 = vmul.f32 %v126_v0, %v39_v1  ;;  %v48_v4 = vld [vmem:[#allocation5 + $0x8] sm:$0xff]  ;;  %v128_v5 = vld [vmem:[#allocation2 + $0x2] ss:$0 sm:$0xff]  ;;  %s116_s1 = sshll.u32 %s209_s0, 4  ;;  %s117_s1 = int_to_ptr.vmem [resolvable:$true] %s116_s1 }
  0x1c   :  { %v57_v6 = vld [vmem:[#allocation5 + $0x10] sm:$0xff]  ;;  %v53_v7 = vmul.f32 %v127_v2, %v48_v4  ;;  %v129_v9 = vld [vmem:[#allocation2 + $0x3] ss:$0 sm:$0xff]  ;;  %v130_v11 = vld [vmem:[#allocation2 + $0x4] ss:$0 sm:$0xff]  ;;  %s179_s21 = scalar_lea.vmem %s117_s1, 128  ;;  %p184_p11 = scmp.lt.s32.totalorder %s117_s1, %s117_s1 }
  0x1d   :  { %v62_v8 = vmul.f32 %v128_v5, %v57_v6  ;;  %v66_v10 = vld [vmem:[#allocation5 + $0x18] sm:$0xff]  ;;  %v75_v12 = vld [vmem:[#allocation5 + $0x20] sm:$0xff]  ;;  %v84_v16 = vld [vmem:[#allocation5 + $0x28] sm:$0xff]  ;;  %p180_p10 = scmp.ne.s32.totalorder %s117_s1, %s179_s21  ;;  %p185_p12 = scmp.lt.s32.totalorder %s179_s21, %s179_s21 }
  0x1e   :  { %v54_v13 = vadd.f32 %v53_v7, %v44_v3  ;;  %v71_v14 = vmul.f32 %v129_v9, %v66_v10  ;;  %v131_v15 = vld [vmem:[#allocation2 + $0x5] ss:$0 sm:$0xff]  ;;  %v80_v18 = vmul.f32 %v130_v11, %v75_v12  ;;  %v132_v19 = vld [vmem:[#allocation2 + $0x6] ss:$0 sm:$0xff]  ;;  %v93_v20 = vld [vmem:[#allocation5 + $0x30] sm:$0xff] }
  0x1f   :  { %v89_v22 = vmul.f32 %v131_v15, %v84_v16  ;;  %v133_v23 = vld [vmem:[#allocation2 + $0x7] ss:$0 sm:$0xff]  ;;  %v98_v26 = vmul.f32 %v132_v19, %v93_v20  ;;  %p186_p13 = por %p185_p12, %p184_p11 }
  0x20   :  { %v63_v17 = vadd.f32 %v62_v8, %v54_v13  ;;  %v102_v24 = vld [vmem:[#allocation5 + $0x38] sm:$0xff] }
  0x21   :  { %v107_v28 = vmul.f32 %v133_v23, %v102_v24  ;;  %p187_p0 = pnand %p186_p13, %p180_p10 }
  0x22   :  { %v72_v21 = vadd.f32 %v71_v14, %v63_v17 }
  0x24   :  { %v81_v25 = vadd.f32 %v80_v18, %v72_v21 }
  0x26   :  { %v90_v27 = vadd.f32 %v89_v22, %v81_v25 }
  0x28   :  { %v99_v29 = vadd.f32 %v98_v26, %v90_v27 }
  0x2a   :  { %v108_v30 = vadd.f32 %v107_v28, %v99_v29 }
  0x2c   :  { %109 = vst [vmem:[#allocation7] sm:$0xff] %v108_v30 }
  0x2d   :  { %190 = shalt.err (!%p187_p0)
}
  0x2e   :  { %119 = dma.vmem_to_hbm [thread:$0]  %s117_s1, 128, %s236_s2, [#allocation4]  }
  0x2f   :  { %203 = dma.done.wait [#allocation4], 128  }
  0x30   :  { %204 = vsyncadd [#allocation4], 4294967168 }
  0x31   :  { %123 = vsyncpa [#allocation3], 1 }
  0x32   :  { %124 = vsyncpa [#allocation6], 1 }
  0x33   :  { %125 = vsyncpa [#allocation4], 1 }

</bundles_post_ra>
